<compile_context>
chip_gen: v7x
topology: tpu7x:2x2x1
jax: 0.10.0
libtpu: 0.0.40
codegen_flags: <defaults>
</compile_context>

<pallas_src>
import functools
import math

import jax
import jax.numpy as jnp
from jax import lax
from jax.experimental import pallas as pl
from jax.experimental.pallas import tpu as pltpu

_VMEM_LIMIT = 32 * 1024 * 1024   # explicit; worst-case block footprint ~6 MiB


# ----------------------------------------------------------------------------
# Pallas matmul kernels: (M,K)@(K,N) + bias (+ ReLU), f32 accumulation
# ----------------------------------------------------------------------------
def _mm_single_kernel(x_ref, w_ref, b_ref, o_ref, *, relu):
    # Single K step: direct-write epilogue, no accumulator scratch traffic.
    y = jnp.dot(x_ref[...], w_ref[...], preferred_element_type=jnp.float32)
    y = y + b_ref[...]
    if relu:
        y = jnp.maximum(y, 0.0)
    o_ref[...] = y.astype(o_ref.dtype)


def _mm_acc_kernel(x_ref, w_ref, b_ref, o_ref, acc_ref, *, relu):
    @pl.when(pl.program_id(2) == 0)
    def _():
        acc_ref[...] = jnp.zeros_like(acc_ref)

    acc_ref[...] += jnp.dot(x_ref[...], w_ref[...],
                            preferred_element_type=jnp.float32)

    @pl.when(pl.program_id(2) == pl.num_programs(2) - 1)
    def _():
        y = acc_ref[...] + b_ref[...]
        if relu:
            y = jnp.maximum(y, 0.0)
        o_ref[...] = y.astype(o_ref.dtype)


@functools.partial(jax.jit, static_argnames=("relu", "out_dtype"))
def matmul_bias_act(x, w, bias, *, relu=True, out_dtype=jnp.bfloat16):
    """bf16 (M,K)@(K,N) + f32 bias[N] (+ReLU); f32 accumulation."""
    M, K = x.shape
    K2, N = w.shape
    assert K == K2 and bias.shape == (N,)
    b2 = bias.astype(jnp.float32).reshape(1, N)

    TM = 512 if M >= 512 else M
    nm = pl.cdiv(M, TM)

    # Small-M deep layers: split N into two 128-multiple tiles so megacore
    # (v7x) gets a parallel axis; stores stay lane-dense.
    if nm == 1 and N >= 512 and N % 256 == 0:
        TN = N // 2
    else:
        TN = N
    nn = N // TN

    if K <= 2048:
        return pl.pallas_call(
            functools.partial(_mm_single_kernel, relu=relu),
            out_shape=jax.ShapeDtypeStruct((M, N), out_dtype),
            grid=(nm, nn),
            in_specs=[
                pl.BlockSpec((TM, K), lambda i, j: (i, 0)),
                pl.BlockSpec((K, TN), lambda i, j: (0, j)),
                pl.BlockSpec((1, TN), lambda i, j: (0, j)),
            ],
            out_specs=pl.BlockSpec((TM, TN), lambda i, j: (i, j)),
            compiler_params=pltpu.CompilerParams(
                dimension_semantics=("parallel", "parallel"),
                vmem_limit_bytes=_VMEM_LIMIT),
        )(x, w, b2)

    # Split-K path (only K=2880 / K=3456 layers).
    TK = 512
    Kp = pl.cdiv(K, TK) * TK
    if Kp != K:
        x = jnp.pad(x, ((0, 0), (0, Kp - K)))
        w = jnp.pad(w, ((0, Kp - K), (0, 0)))
        K = Kp
    nk = K // TK
    return pl.pallas_call(
        functools.partial(_mm_acc_kernel, relu=relu),
        out_shape=jax.ShapeDtypeStruct((M, N), out_dtype),
        grid=(nm, nn, nk),
        in_specs=[
            pl.BlockSpec((TM, TK), lambda i, j, k: (i, k)),
            pl.BlockSpec((TK, TN), lambda i, j, k: (k, j)),
            pl.BlockSpec((1, TN), lambda i, j, k: (0, j)),
        ],
        out_specs=pl.BlockSpec((TM, TN), lambda i, j, k: (i, j)),
        scratch_shapes=[pltpu.VMEM((TM, TN), jnp.float32)],
        compiler_params=pltpu.CompilerParams(
            dimension_semantics=("parallel", "parallel", "arbitrary"),
            vmem_limit_bytes=_VMEM_LIMIT),
    )(x, w, b2)


# ----------------------------------------------------------------------------
# Conv + folded-BN + ReLU (BasicConv2d)
# ----------------------------------------------------------------------------
@functools.partial(jax.jit, static_argnames=("stride", "pad", "relu", "out_dtype"))
def conv_bn_act(x, w, bias, *, stride, pad, relu=True, out_dtype=jnp.bfloat16):
    """x: NHWC bf16; w: HWIO bf16 (BN scale folded in); bias: f32 per Cout."""
    N, H, W, Cin = x.shape
    kh, kw, Cin2, Cout = w.shape
    assert Cin == Cin2
    sh, sw = stride
    ph, pw = pad
    Ho = (H + 2 * ph - kh) // sh + 1
    Wo = (W + 2 * pw - kw) // sw + 1

    if (kh, kw, sh, sw, ph, pw) == (1, 1, 1, 1, 0, 0):
        xmat = x.reshape(N * H * W, Cin)                 # free reshape
        wmat = w.reshape(Cin, Cout)
    else:
        # TODO(synk): implicit-GEMM (in-kernel tap windows) would avoid this
        # HBM im2col materialization entirely.
        xp = jnp.pad(x, ((0, 0), (ph, ph), (pw, pw), (0, 0))) if (ph or pw) else x
        cols = []
        for dy in range(kh):
            for dx in range(kw):
                cols.append(xp[:, dy:dy + sh * (Ho - 1) + 1:sh,
                               dx:dx + sw * (Wo - 1) + 1:sw, :])
        K = kh * kw * Cin
        if K > 2048:                      # split-K path needs 512-multiples
            Kp = pl.cdiv(K, 512) * 512
        else:                             # single K block: only align to 32
            Kp = pl.cdiv(K, 32) * 32      # (first conv: 27 -> 32, not 128)
        if Kp > K:   # fold the K alignment pad into the im2col materialization
            cols.append(jnp.zeros((N, Ho, Wo, Kp - K), x.dtype))
        xmat = jnp.concatenate(cols, axis=-1).reshape(N * Ho * Wo, Kp)
        wmat = w.reshape(K, Cout)
        if Kp > K:
            wmat = jnp.pad(wmat, ((0, Kp - K), (0, 0)))
    out = matmul_bias_act(xmat, wmat, bias, relu=relu, out_dtype=out_dtype)
    return out.reshape(N, Ho, Wo, Cout)


# ----------------------------------------------------------------------------
# Pooling kernels
# ----------------------------------------------------------------------------
def _avgpool_kernel(x_ref, o_ref, *, k, Ho, Wo, inv):
    # x_ref: (1, Hp, Wp, CT)  o_ref: (1, Ho, Wo, CT); stride==1 windows
    # (also covers the global pool where Ho == Wo == 1).
    ct = x_ref.shape[3]

    def row(ho, carry):
        acc = jnp.zeros((Wo, ct), jnp.float32)
        for dy in range(k):
            for dx in range(k):
                acc = acc + x_ref[0, ho + dy, pl.ds(dx, Wo), :].astype(jnp.float32)
        o_ref[0, ho] = (acc * inv).astype(o_ref.dtype)
        return carry

    lax.fori_loop(0, Ho, row, 0)


@functools.partial(jax.jit, static_argnames=("k", "stride", "pad"))
def avgpool2d(x, *, k, stride, pad):
    """AvgPool2d, torch defaults (count_include_pad=True -> divide by k*k)."""
    N, H, W, C = x.shape
    Ho = (H + 2 * pad - k) // stride + 1
    Wo = (W + 2 * pad - k) // stride + 1
    assert stride == 1 or (Ho == 1 and Wo == 1)
    xp = jnp.pad(x, ((0, 0), (pad, pad), (pad, pad), (0, 0))) if pad else x
    Hp, Wp = H + 2 * pad, W + 2 * pad
    CT = C if C <= 512 else 512
    assert C % CT == 0
    return pl.pallas_call(
        functools.partial(_avgpool_kernel, k=k, Ho=Ho, Wo=Wo, inv=1.0 / (k * k)),
        out_shape=jax.ShapeDtypeStruct((N, Ho, Wo, C), x.dtype),
        grid=(N, C // CT),
        in_specs=[pl.BlockSpec((1, Hp, Wp, CT), lambda n, c: (n, 0, 0, c))],
        out_specs=pl.BlockSpec((1, Ho, Wo, CT), lambda n, c: (n, 0, 0, c)),
        compiler_params=pltpu.CompilerParams(
            dimension_semantics=("parallel", "parallel")),
    )(xp)


def _maxpool_s2_kernel(xe_ref, xo_ref, o_ref, *, k, Ho, Wo):
    # Stride-2 max pool.  xe/xo hold the even / odd input columns of the
    # -inf-padded activation, so all in-kernel reads are contiguous.
    ct = o_ref.shape[3]
    refs = (xe_ref, xo_ref)

    def row(ho, carry):
        m = jnp.full((Wo, ct), -jnp.inf, jnp.float32)
        for dy in range(k):
            h = 2 * ho + dy
            for dx in range(k):
                v = refs[dx % 2][0, h, pl.ds(dx // 2, Wo), :]
                m = jnp.maximum(m, v.astype(jnp.float32))
        o_ref[0, ho] = m.astype(o_ref.dtype)
        return carry

    lax.fori_loop(0, Ho, row, 0)


@functools.partial(jax.jit, static_argnames=("k", "stride", "pad"))
def maxpool2d(x, *, k, stride, pad):
    """MaxPool2d (torch semantics: borders padded with -inf), stride 2."""
    assert stride == 2
    N, H, W, C = x.shape
    Ho = (H + 2 * pad - k) // stride + 1
    Wo = (W + 2 * pad - k) // stride + 1
    if pad:
        xp = jnp.pad(x, ((0, 0), (pad, pad), (pad, pad), (0, 0)),
                     constant_values=-jnp.inf)
    else:
        xp = x
    Hp, Wp = H + 2 * pad, W + 2 * pad
    xe = xp[:, :, 0::2, :]                 # even input columns
    xo = xp[:, :, 1::2, :]                 # odd  input columns
    We, Wod = xe.shape[2], xo.shape[2]
    assert (k - 1) // 2 + Wo <= We and (k >= 2 and (k - 2) // 2 + Wo <= Wod)
    CT = C if C <= 512 else 512
    assert C % CT == 0
    return pl.pallas_call(
        functools.partial(_maxpool_s2_kernel, k=k, Ho=Ho, Wo=Wo),
        out_shape=jax.ShapeDtypeStruct((N, Ho, Wo, C), x.dtype),
        grid=(N, C // CT),
        in_specs=[pl.BlockSpec((1, Hp, We, CT), lambda n, c: (n, 0, 0, c)),
                  pl.BlockSpec((1, Hp, Wod, CT), lambda n, c: (n, 0, 0, c))],
        out_specs=pl.BlockSpec((1, Ho, Wo, CT), lambda n, c: (n, 0, 0, c)),
        compiler_params=pltpu.CompilerParams(
            dimension_semantics=("parallel", "parallel")),
    )(xe, xo)


# ----------------------------------------------------------------------------
# Deterministic synthetic parameters (BN scale folded into conv weights)
# ----------------------------------------------------------------------------
class ParamGen:
    def __init__(self, key):
        self.key = key
        self.ctr = 0

    def _next_key(self):
        self.ctr += 1
        return jax.random.fold_in(self.key, self.ctr)

    def conv(self, cin, cout, kh, kw):
        w = jax.random.normal(self._next_key(), (kh, kw, cin, cout),
                              jnp.float32) * math.sqrt(2.0 / (kh * kw * cin))
        eps = 1e-5
        # BN inference: gamma=1, beta=0, running_mean=0, running_var=1
        scale = 1.0 / math.sqrt(1.0 + eps)
        w = (w * scale).astype(jnp.bfloat16)          # fold BN scale into W
        bias = jnp.zeros((cout,), jnp.float32)        # beta - mean*scale == 0
        return w, bias

    def linear(self, din, dout):
        bound = 1.0 / math.sqrt(din)
        w = jax.random.uniform(self._next_key(), (din, dout), jnp.float32,
                               -bound, bound).astype(jnp.bfloat16)
        b = jax.random.uniform(self._next_key(), (dout,), jnp.float32,
                               -bound, bound)
        return w, b


def _pair(v):
    return (v, v) if isinstance(v, int) else tuple(v)


def basic_conv(p, x, cin, cout, ksize, stride=1, padding=0):
    kh, kw = _pair(ksize)
    assert x.shape[-1] == cin
    w, bias = p.conv(cin, cout, kh, kw)
    return conv_bn_act(x, w, bias, stride=_pair(stride), pad=_pair(padding),
                       relu=True)


def merged_conv1x1(p, x, cin, couts):
    """Sibling 1x1 BasicConv2d's sharing the same input -> one lane-dense
    matmul (reads the activation once, unmasked stores); slice per branch."""
    assert x.shape[-1] == cin
    ws, bs = [], []
    for cout in couts:
        w, b = p.conv(cin, cout, 1, 1)
        ws.append(w)
        bs.append(b)
    w = jnp.concatenate(ws, axis=-1)
    b = jnp.concatenate(bs)
    y = conv_bn_act(x, w, b, stride=(1, 1), pad=(0, 0), relu=True)
    outs, off = [], 0
    for cout in couts:
        outs.append(y[..., off:off + cout])
        off += cout
    return outs


# ----------------------------------------------------------------------------
# InceptionV4 blocks (functional, NHWC)
# ----------------------------------------------------------------------------
def stem(p, x):
    x = basic_conv(p, x, 3, 32, 3, stride=2)
    x = basic_conv(p, x, 32, 32, 3)
    x = basic_conv(p, x, 32, 64, 3, padding=1)
    a = basic_conv(p, x, 64, 96, 3, stride=2, padding=1)
    b = maxpool2d(x, k=3, stride=2, pad=1)
    x = jnp.concatenate([a, b], axis=-1)                     # 160
    ha, hb = merged_conv1x1(p, x, 160, (64, 64))             # 7x7a/b heads
    a = basic_conv(p, ha, 64, 64, (7, 1), padding=(3, 0))
    a = basic_conv(p, a, 64, 64, (1, 7), padding=(0, 3))
    a = basic_conv(p, a, 64, 96, 3, padding=1)
    b = basic_conv(p, hb, 64, 96, 3, padding=1)
    x = jnp.concatenate([a, b], axis=-1)                     # 192
    a = maxpool2d(x, k=3, stride=2, pad=1)
    b = basic_conv(p, x, 192, 192, 3, stride=2, padding=1)
    return jnp.concatenate([a, b], axis=-1)                  # 384


def inception_a(p, x, cin):
    hs, h3, b1 = merged_conv1x1(p, x, cin, (64, 64, 96))     # N=224 head
    s = basic_conv(p, hs, 64, 96, 3, padding=1)
    s = basic_conv(p, s, 96, 96, 3, padding=1)
    b3 = basic_conv(p, h3, 64, 96, 3, padding=1)
    bp = avgpool2d(x, k=3, stride=1, pad=1)
    bp = basic_conv(p, bp, cin, 96, 1)
    return jnp.concatenate([s, b3, b1, bp], axis=-1)         # 384


def reduction_a(p, x, cin, k, l, m, n):
    s = basic_conv(p, x, cin, k, 1)
    s = basic_conv(p, s, k, l, 3, padding=1)
    s = basic_conv(p, s, l, m, 3, stride=2)
    b = basic_conv(p, x, cin, n, 3, stride=2)
    bp = maxpool2d(x, k=3, stride=2, pad=0)
    return jnp.concatenate([s, b, bp], axis=-1)              # cin + n + m


def inception_b(p, x, cin):
    hs, h7, b1 = merged_conv1x1(p, x, cin, (192, 192, 384))  # N=768 head
    s = basic_conv(p, hs, 192, 192, (1, 7), padding=(0, 3))
    s = basic_conv(p, s, 192, 224, (7, 1), padding=(3, 0))
    s = basic_conv(p, s, 224, 224, (1, 7), padding=(0, 3))
    s = basic_conv(p, s, 224, 256, (7, 1), padding=(3, 0))
    b7 = basic_conv(p, h7, 192, 224, (1, 7), padding=(0, 3))
    b7 = basic_conv(p, b7, 224, 256, (7, 1), padding=(3, 0))
    bp = avgpool2d(x, k=3, stride=1, pad=1)
    bp = basic_conv(p, bp, cin, 128, 1)
    return jnp.concatenate([b1, b7, s, bp], axis=-1)         # 1024


def reduction_b(p, x, cin):
    h7, h3 = merged_conv1x1(p, x, cin, (256, 192))           # N=448 head
    b7 = basic_conv(p, h7, 256, 256, (1, 7), padding=(0, 3))
    b7 = basic_conv(p, b7, 256, 320, (7, 1), padding=(3, 0))
    b7 = basic_conv(p, b7, 320, 320, 3, stride=2, padding=1)
    b3 = basic_conv(p, h3, 192, 192, 3, stride=2, padding=1)
    bp = maxpool2d(x, k=3, stride=2, pad=1)
    return jnp.concatenate([b3, b7, bp], axis=-1)            # 1536


def inception_c(p, x, cin):
    hs, hb, b1 = merged_conv1x1(p, x, cin, (384, 384, 256))  # N=1024 head
    s = basic_conv(p, hs, 384, 448, (1, 3), padding=(0, 1))
    s = basic_conv(p, s, 448, 512, (3, 1), padding=(1, 0))
    sa = basic_conv(p, s, 512, 256, (1, 3), padding=(0, 1))
    sb = basic_conv(p, s, 512, 256, (3, 1), padding=(1, 0))
    scat = jnp.concatenate([sa, sb], axis=-1)
    ba = basic_conv(p, hb, 384, 256, (3, 1), padding=(1, 0))
    bb = basic_conv(p, hb, 384, 256, (1, 3), padding=(0, 1))
    bcat = jnp.concatenate([ba, bb], axis=-1)
    bp = avgpool2d(x, k=3, stride=1, pad=1)
    bp = basic_conv(p, bp, cin, 256, 1)
    return jnp.concatenate([b1, bcat, scat, bp], axis=-1)    # 1536


def inception_v4_forward(p, x_nchw, A=1, B=1, C=1,
                         k=192, l=224, m=256, n=384, class_nums=38):
    x = jnp.transpose(x_nchw, (0, 2, 3, 1)).astype(jnp.bfloat16)  # NCHW->NHWC
    x = stem(p, x)
    for _ in range(A):
        x = inception_a(p, x, 384)
    x = reduction_a(p, x, 384, k, l, m, n)
    cin = 384 + n + m                                        # 1024
    for _ in range(B):
        x = inception_b(p, x, cin)
        cin = 1024
    x = reduction_b(p, x, 1024)
    cin = 1536
    for _ in range(C):
        x = inception_c(p, x, cin)
        cin = 1536
    x = avgpool2d(x, k=7, stride=7, pad=0)                   # (N,1,1,1536)
    # Dropout2d(0.2): inference-mode identity
    feat = x.reshape(x.shape[0], 1536)                       # == torch .view(-1,1536)
    w, b = p.linear(1536, class_nums)
    logits = matmul_bias_act(feat, w, b, relu=False, out_dtype=jnp.float32)
    return logits


# ----------------------------------------------------------------------------
if __name__ == "__main__":
    key = jax.random.PRNGKey(0)
    pkey, xkey = jax.random.split(key)

    # Smallest spatial size the architecture admits (AvgPool2d(7) at the end
    # requires a 7x7 feature map): 215x215 RGB, batch 2.
    x = jax.random.normal(xkey, (2, 3, 215, 215), jnp.float32)

    @jax.jit
    def run(inp):
        # Whole-forward jit: one dispatch; deterministic synthetic params are
        # regenerated at trace time from the fixed key.
        return inception_v4_forward(ParamGen(pkey), inp,
                                    A=1, B=1, C=1, class_nums=38)

    logits = jax.block_until_ready(run(x))

    assert logits.shape == (2, 38)
    assert bool(jnp.all(jnp.isfinite(logits)))
    print("KERNEL_OK")
</pallas_src>

<mosaic_0001>
module attributes {stable_mosaic.version = 11 : i64} {
  func.func @_mm_single_kernel(%arg0: i32, %arg1: i32, %arg2: memref<512x32xbf16, #tpu.memory_space<vmem>>, %arg3: memref<32x32xbf16, #tpu.memory_space<vmem>>, %arg4: memref<1x32xf32, #tpu.memory_space<vmem>>, %arg5: memref<512x32xbf16, #tpu.memory_space<vmem>>) attributes {dimension_semantics = [#tpu.dimension_semantics<parallel>, #tpu.dimension_semantics<parallel>], iteration_bounds = array<i64: 45, 1>, scalar_prefetch = 0 : i64, scratch_operands = 0 : i64, tpu.core_type = #tpu.core_type<tc>, window_params = [{transform_indices = @transform_0, window_bounds = array<i64: 512, 32>}, {transform_indices = @transform_1, window_bounds = array<i64: 32, 32>}, {transform_indices = @transform_2, window_bounds = array<i64: 1, 32>}, {transform_indices = @transform_3, window_bounds = array<i64: 512, 32>}]} {
    %c0 = arith.constant 0 : index
    %c0_0 = arith.constant 0 : index
    %0 = vector.load %arg2[%c0, %c0_0] : memref<512x32xbf16, #tpu.memory_space<vmem>>, vector<512x32xbf16>
    %c0_1 = arith.constant 0 : index
    %c0_2 = arith.constant 0 : index
    %1 = vector.load %arg3[%c0_1, %c0_2] : memref<32x32xbf16, #tpu.memory_space<vmem>>, vector<32x32xbf16>
    %cst = arith.constant dense<0.000000e+00> : vector<512x32xf32>
    %2 = tpu.matmul %0, %1, %cst {dimension_numbers = #tpu.dot_dimension_numbers<[1], [0], [0], [1], [0, 0, 1, 1], [], []>} : vector<512x32xbf16>, vector<32x32xbf16>, vector<512x32xf32> -> vector<512x32xf32>
    %c0_3 = arith.constant 0 : index
    %c0_4 = arith.constant 0 : index
    %3 = vector.load %arg4[%c0_3, %c0_4] : memref<1x32xf32, #tpu.memory_space<vmem>>, vector<1x32xf32>
    %4 = vector.broadcast %3 : vector<1x32xf32> to vector<512x32xf32>
    %5 = arith.addf %2, %4 : vector<512x32xf32>
    %cst_5 = arith.constant 0.000000e+00 : f32
    %6 = vector.broadcast %cst_5 : f32 to vector<512x32xf32>
    %7 = arith.maximumf %5, %6 : vector<512x32xf32>
    %8 = arith.truncf %7 : vector<512x32xf32> to vector<512x32xbf16>
    %c0_6 = arith.constant 0 : index
    %c0_7 = arith.constant 0 : index
    %9 = vector.load %arg5[%c0_6, %c0_7] : memref<512x32xbf16, #tpu.memory_space<vmem>>, vector<512x32xbf16>
    tpu.vector_store %arg5[%c0_6, %c0_7], %8 {strides = array<i32>} : memref<512x32xbf16, #tpu.memory_space<vmem>>, vector<512x32xbf16>,
    return
  }
  func.func @transform_0(%arg0: i32, %arg1: i32) -> (i32, i32) {
    %c0_i32 = arith.constant 0 : i32
    %c0_i32_0 = arith.constant 0 : i32
    return %arg0, %c0_i32 : i32, i32
  }
  func.func @transform_1(%arg0: i32, %arg1: i32) -> (i32, i32) {
    %c0_i32 = arith.constant 0 : i32
    %c0_i32_0 = arith.constant 0 : i32
    return %c0_i32, %arg1 : i32, i32
  }
  func.func @transform_2(%arg0: i32, %arg1: i32) -> (i32, i32) {
    %c0_i32 = arith.constant 0 : i32
    %c0_i32_0 = arith.constant 0 : i32
    return %c0_i32, %arg1 : i32, i32
  }
  func.func @transform_3(%arg0: i32, %arg1: i32) -> (i32, i32) {
    %c0_i32 = arith.constant 0 : i32
    return %arg0, %arg1 : i32, i32
  }
}

</mosaic_0001>

<bundles_post_ra>
// kernel: matmul_bias_act.1
= control target key start
LH: loop header
LB: loop body
LE: loop exit
PB: predicated region body
PF: predicated region fallthrough
CT: control target
= control target key end

     0   :  { %s2353_s12 = smov 0   ;;  %s2355_s13 = smov 0   ;;  %s2880_s0 = inlined_call_operand.vmem [shape: bf16[22898,32], index: 0, kind: input, shape index: {}]   ;;  %s2881_s1 = inlined_call_operand.vmem [shape: bf16[32,32], index: 1, kind: input, shape index: {}]   ;;  %s2882_s2 = inlined_call_operand.vmem [shape: f32[1,32], index: 2, kind: input, shape index: {}]   ;;  %s2883_s3 = inlined_call_operand.vmem [shape: bf16[22898,32], index: 3, kind: output, shape index: {}]  }
   0x1   :  { %s2357_s14 = smov 0   ;;  %s2359_s15 = smov 0  }
   0x2   :  { %s2361_s16 = smov 0  }
   0x3 LB: > { %s1760_s17 = sadd.s32 4294967295, %s2299_s16   ;;  %s25_s18 = sadd.s32 1, %s2295_s15  ;;  %s2299_s16 = sphi %s2361_s16, %s13_s16   ;;  %s2295_s15 = sphi %s2359_s15, %s2891_s15   ;;  %s2291_s14 = sphi %s2357_s14, %s2890_s14   ;;  %s2287_s13 = sphi %s2355_s13, %s2889_s13   ;;  %s2283_s12 = sphi %s2353_s12, %s2888_s12  }
   0x4   : > { %p27_p0 = scmp.ge.s32.totalorder %s25_s18, 45  ;;  %s112_s19 = sadd.s32 1, %s2287_s13 }
   0x5   : > { %p122_p1 = scmp.ne.s32.totalorder %s2287_s13, %s2283_s12  ;;  %p123_p2 = scmp.eq.s32.totalorder %s1760_s17, 44 }
   0x6   : > { %s2893_s18 = smov (%p27_p0, %s25_s18), 0  ;;  %p1766_p4 = scmp.ge.s32.totalorder %s2299_s16, 1 }
   0x7   : > { %p2385_p3 = por %p123_p2, %p122_p1  ;;  %s107_s21 = ssub.s32 %s2295_s15, %s2893_s18 }
   0x8   : > { %p177_p5 = scmp.lt.s32.totalorder %s2299_s16, 46  ;;  %p110_p6 = scmp.eq.s32.totalorder %s107_s21, 0 }
   0xa   : > { %p178_p7 = pnand %p1766_p4, %p177_p5 }
   0xb   : > { %s2394_s22 = scalar_select %p110_p6, %s2287_s13, %s112_s19  }
   0xc   : > { %181 = sbr.rel (%p178_p7) target bundleno = 395 (0x18b), region = 32  ;;  %v2195_v0 = vld [vmem:[%s2881_s1] sm:$0xff] (!%p178_p7)   ;;  %s2400_s25 = sshll.u32 (!%p178_p7), %s2291_s14, 6  ;;  %v2196_v1 = vld [vmem:[%s2881_s1 + $0x8] sm:$0xff] (!%p178_p7)   ;;  %vm485_vm0 = vcmask (!%p178_p7), 261120   ;;  %vm1191_vm1 = vcmask (!%p178_p7), 257024  }
   0xd   : > { %p216_p8 = scmp.lt.s32.totalorder (!%p178_p7), %s2400_s25, 2862  ;;  %2019 = vmatprep.subr.bf16.mxu0 (!%p178_p7), %v2195_v0  ;;  %2087 = vmatprep.subr.bf16.mxu1 (!%p178_p7), %v2195_v0  ;;  %s208_s6 = sand.u32 (!%p178_p7), 1, %s2283_s12   ;;  %v2480_v34 = vld [vmem:[%s2882_s2] ss:$0 sm:$0xff] (!%p178_p7) }
   0xe   : > { %2020 = vmatpush3.bf16.msra.mxu0 (!%p178_p7), %v2195_v0  ;;  %2089 = vmatpush3.bf16.msra.mxu1 (!%p178_p7), %v2195_v0  ;;  %s1767_s9 = sshll.u32 (!%p178_p7), %s208_s6, 8 }
   0xf   : > { %2021 = vmatprep.subr.bf16.mxu0 (!%p178_p7), %v2196_v1  ;;  %2088 = vmatprep.subr.bf16.mxu1 (!%p178_p7), %v2196_v1  ;;  %s2490_s10 = scalar_lea.vmem (!%p178_p7), [#allocation2], %s1767_s9  }
  0x12   : > { %2022 = vmatpush3.bf16.msra.mxu0 (!%p178_p7), %v2196_v1  ;;  %2090 = vmatpush3.bf16.msra.mxu1 (!%p178_p7), %v2196_v1 }
  0x13   : > { %s217_s28 = scalar_select %p216_p8, %s2400_s25, 2862 }
  0x14   : > { %s1264_s11 = ssub.s32 (%p2385_p3), 2863, %s2400_s25  ;;  %s1982_s12 = sshll.u32 (%p2385_p3), %s2291_s14, 8 }
  0x15   : > { %s1769_s29 = sshll.u32 %s217_s28, 2  ;;  %p1265_p9 = scmp.lt.s32.totalorder (%p2385_p3), %s1264_s11, 64 }
  0x16   : > { %s2410_s5 = scalar_lea.vmem %s2880_s0, %s1769_s29  ;;  %s2683_s21 = scalar_lea.vmem (%p2385_p3), %s2883_s3, %s1982_s12  }
  0x17   : > { %v2197_v2 = vld [vmem:[%s2410_s5] sm:$0xff]   ;;  %v2199_v4 = vld [vmem:[%s2410_s5 + $0x8] sm:$0xff]   ;;  %v2201_v6 = vld [vmem:[%s2410_s5 + $0x10] sm:$0xff]  }
  0x18   : > { %v2198_v3 = vld [vmem:[%s2410_s5 + $0x80] sm:$0xff]   ;;  %2023 = vmatprep.mubr.msk.bf16.mxu0 %vm485_vm0, %v2197_v2  ;;  %v2200_v5 = vld [vmem:[%s2410_s5 + $0x88] sm:$0xff]   ;;  %v2202_v7 = vld [vmem:[%s2410_s5 + $0x90] sm:$0xff]  }
  0x19   : > { %2055 = vmatprep.mubr.msk.bf16.mxu1 %vm485_vm0, %v2198_v3  ;;  %2024 = vmatmul.mubr.msk.bf16.vlgmr.msra.gmra.mrb[0].mxu0 %vm485_vm0, %v2199_v4  ;;  %v2203_v8 = vld [vmem:[%s2410_s5 + $0x18] sm:$0xff]   ;;  %v2205_v10 = vld [vmem:[%s2410_s5 + $0x20] sm:$0xff]   ;;  %v2207_v12 = vld [vmem:[%s2410_s5 + $0x28] sm:$0xff]  }
  0x1a   : > { %2056 = vmatmul.mubr.msk.bf16.vlgmr.msra.gmra.mrb[0].mxu1 %vm485_vm0, %v2200_v5  ;;  %2027 = vmatprep.mubr.msk.bf16.mxu0 %vm485_vm0, %v2201_v6  ;;  %v2204_v9 = vld [vmem:[%s2410_s5 + $0x98] sm:$0xff]   ;;  %v2206_v11 = vld [vmem:[%s2410_s5 + $0xa0] sm:$0xff]   ;;  %v2208_v13 = vld [vmem:[%s2410_s5 + $0xa8] sm:$0xff]  }
  0x1b   : > { %2059 = vmatprep.mubr.msk.bf16.mxu1 %vm485_vm0, %v2202_v7  ;;  %v2209_v14 = vld [vmem:[%s2410_s5 + $0x30] sm:$0xff]   ;;  %v2211_v16 = vld [vmem:[%s2410_s5 + $0x38] sm:$0xff]   ;;  %v2213_v18 = vld [vmem:[%s2410_s5 + $0x40] sm:$0xff]  }
  0x1c   : > { %v2210_v15 = vld [vmem:[%s2410_s5 + $0xb0] sm:$0xff]   ;;  %v2212_v17 = vld [vmem:[%s2410_s5 + $0xb8] sm:$0xff]   ;;  %v2214_v19 = vld [vmem:[%s2410_s5 + $0xc0] sm:$0xff]  }
  0x1d   : > { %v2215_v20 = vld [vmem:[%s2410_s5 + $0x48] sm:$0xff]   ;;  %v2217_v22 = vld [vmem:[%s2410_s5 + $0x50] sm:$0xff]   ;;  %v2219_v24 = vld [vmem:[%s2410_s5 + $0x58] sm:$0xff]  }
  0x1e   : > { %v2216_v21 = vld [vmem:[%s2410_s5 + $0xc8] sm:$0xff]   ;;  %v2218_v23 = vld [vmem:[%s2410_s5 + $0xd0] sm:$0xff]   ;;  %v2220_v25 = vld [vmem:[%s2410_s5 + $0xd8] sm:$0xff]  }
  0x1f   : > { %v2221_v26 = vld [vmem:[%s2410_s5 + $0x60] sm:$0xff]   ;;  %v2223_v28 = vld [vmem:[%s2410_s5 + $0x68] sm:$0xff]   ;;  %v2225_v30 = vld [vmem:[%s2410_s5 + $0x70] sm:$0xff]  }
  0x20   : > { %v2222_v27 = vld [vmem:[%s2410_s5 + $0xe0] sm:$0xff]   ;;  %v2224_v29 = vld [vmem:[%s2410_s5 + $0xe8] sm:$0xff]   ;;  %v2226_v31 = vld [vmem:[%s2410_s5 + $0xf0] sm:$0xff]  }
  0x21   : > { %2028 = vmatmul.mubr.msk.bf16.gmra.mrb[4].mxu0 %vm485_vm0, %v2203_v8  ;;  %v2227_v32 = vld [vmem:[%s2410_s5 + $0x78] sm:$0xff]  }
  0x22   : > { %2060 = vmatmul.mubr.msk.bf16.gmra.mrb[4].mxu1 %vm485_vm0, %v2204_v9  ;;  %2031 = vmatprep.mubr.msk.bf16.mxu0 %vm485_vm0, %v2205_v10  ;;  %v2228_v33 = vld [vmem:[%s2410_s5 + $0xf8] sm:$0xff]  }
  0x23   : > { %2063 = vmatprep.mubr.msk.bf16.mxu1 %vm485_vm0, %v2206_v11 }
  0x29   : > { %2032 = vmatmul.mubr.msk.bf16.gmra.mrb[8].mxu0 %vm485_vm0, %v2207_v12 }
  0x2a   : > { %2064 = vmatmul.mubr.msk.bf16.gmra.mrb[8].mxu1 %vm485_vm0, %v2208_v13  ;;  %2035 = vmatprep.mubr.msk.bf16.mxu0 %vm485_vm0, %v2209_v14 }
  0x2b   : > { %2067 = vmatprep.mubr.msk.bf16.mxu1 %vm485_vm0, %v2210_v15 }
  0x31   : > { %2036 = vmatmul.mubr.msk.bf16.gmra.mrb[12].mxu0 %vm485_vm0, %v2211_v16 }
  0x32   : > { %2068 = vmatmul.mubr.msk.bf16.gmra.mrb[12].mxu1 %vm485_vm0, %v2212_v17  ;;  %2039 = vmatprep.mubr.msk.bf16.mxu0 %vm485_vm0, %v2213_v18 }
  0x33   : > { %2071 = vmatprep.mubr.msk.bf16.mxu1 %vm485_vm0, %v2214_v19 }
  0x39   : > { %2040 = vmatmul.mubr.msk.bf16.gmra.mrb[16].mxu0 %vm485_vm0, %v2215_v20 }
  0x3a   : > { %2072 = vmatmul.mubr.msk.bf16.gmra.mrb[16].mxu1 %vm485_vm0, %v2216_v21  ;;  %2043 = vmatprep.mubr.msk.bf16.mxu0 %vm485_vm0, %v2217_v22 }
  0x3b   : > { %2075 = vmatprep.mubr.msk.bf16.mxu1 %vm485_vm0, %v2218_v23 }
  0x41   : > { %2044 = vmatmul.mubr.msk.bf16.gmra.mrb[20].mxu0 %vm485_vm0, %v2219_v24 }
  0x42   : > { %2076 = vmatmul.mubr.msk.bf16.gmra.mrb[20].mxu1 %vm485_vm0, %v2220_v25  ;;  %2047 = vmatprep.mubr.msk.bf16.mxu0 %vm485_vm0, %v2221_v26 }
  0x43   : > { %2079 = vmatprep.mubr.msk.bf16.mxu1 %vm485_vm0, %v2222_v27 }
  0x49   : > { %2048 = vmatmul.mubr.msk.bf16.gmra.mrb[24].mxu0 %vm485_vm0, %v2223_v28 }
  0x4a   : > { %2080 = vmatmul.mubr.msk.bf16.gmra.mrb[24].mxu1 %vm485_vm0, %v2224_v29  ;;  %2051 = vmatprep.mubr.msk.bf16.mxu0 %vm485_vm0, %v2225_v30 }
  0x4b   : > { %2083 = vmatprep.mubr.msk.bf16.mxu1 %vm485_vm0, %v2226_v31 }
  0x51   : > { %2052 = vmatmul.mubr.msk.bf16.gmra.mrb[28].mxu0 %vm485_vm0, %v2227_v32 }
  0x52   : > { %2084 = vmatmul.mubr.msk.bf16.gmra.mrb[28].mxu1 %vm485_vm0, %v2228_v33 }
  0xec   : > { %v2025_v35 = vpop.f32.mrb[0].mxu0 }
  0xed   : > { %v625_v36 = vadd.f32 %v2025_v35, %v2480_v34  ;;  %v2057_v37 = vpop.f32.mrb[0].mxu1  ;;  %v616_v38 = vpop.f32.mrb[1].mxu0 }
  0xee   : > { %v753_v39 = vadd.f32 %v2057_v37, %v2480_v34  ;;  %v617_v40 = vadd.f32 %v2480_v34, %v616_v38  ;;  %v744_v41 = vpop.f32.mrb[1].mxu1  ;;  %v2026_v42 = vpop.f32.mrb[2].mxu0 }
  0xef   : > { %v873_v43 = vmax.f32 %v625_v36, 0.0  ;;  %v745_v44 = vadd.f32 %v2480_v34, %v744_v41  ;;  %v628_v45 = vadd.f32 %v2026_v42, %v2480_v34  ;;  %v2058_v46 = vpop.f32.mrb[2].mxu1  ;;  %v619_v47 = vpop.f32.mrb[3].mxu0 }
  0xf0   : > { %v905_v48 = vmax.f32 %v753_v39, 0.0  ;;  %v871_v49 = vmax.f32 %v617_v40, 0.0  ;;  %v756_v50 = vadd.f32 %v2058_v46, %v2480_v34  ;;  %v620_v51 = vadd.f32 %v2480_v34, %v619_v47  ;;  %v747_v52 = vpop.f32.mrb[3].mxu1 }
  0xf1   : > { %v1920_v53 = vpack.c.bf16 %v873_v43, %v873_v43  ;;  %v903_v54 = vmax.f32 %v745_v44, 0.0  ;;  %v874_v55 = vmax.f32 %v628_v45, 0.0  ;;  %v748_v56 = vadd.f32 %v2480_v34, %v747_v52 }
  0xf2   : > { %v1952_v57 = vpack.c.bf16 %v905_v48, %v905_v48  ;;  %v1918_v58 = vpack.c.bf16 %v871_v49, %v871_v49  ;;  %v906_v59 = vmax.f32 %v756_v50, 0.0  ;;  %v872_v60 = vmax.f32 %v620_v51, 0.0 }
  0xf3   : > { %1194 = vst.msk [vmem:[%s2490_s10 + $0x8] sm:$0xf] %vm1191_vm1, %v1920_v53  ;;  %v1950_v61 = vpack.c.bf16 %v903_v54, %v903_v54  ;;  %v1921_v62 = vpack.c.bf16 %v874_v55, %v874_v55  ;;  %v904_v63 = vmax.f32 %v748_v56, 0.0 }
  0xf4   : > { %1226 = vst.msk [vmem:[%s2490_s10 + $0x88] sm:$0xf] %vm1191_vm1, %v1952_v57  ;;  %1192 = vst.msk [vmem:[%s2490_s10] sm:$0xf] %vm1191_vm1, %v1918_v58  ;;  %v1953_v0 = vpack.c.bf16 %v906_v59, %v906_v59  ;;  %v1919_v1 = vpack.c.bf16 %v872_v60, %v872_v60  ;;  %v2029_v2 = vpop.f32.mrb[4].mxu0 }
  0xf5   : > { %1224 = vst.msk [vmem:[%s2490_s10 + $0x80] sm:$0xf] %vm1191_vm1, %v1950_v61  ;;  %1195 = vst.msk [vmem:[%s2490_s10 + $0xc] sm:$0xf] %vm1191_vm1, %v1921_v62  ;;  %v1951_v3 = vpack.c.bf16 %v904_v63, %v904_v63  ;;  %v641_v4 = vadd.f32 %v2029_v2, %v2480_v34  ;;  %v2061_v5 = vpop.f32.mrb[4].mxu1  ;;  %v632_v6 = vpop.f32.mrb[5].mxu0 }
  0xf6   : > { %1227 = vst.msk [vmem:[%s2490_s10 + $0x8c] sm:$0xf] %vm1191_vm1, %v1953_v0  ;;  %1193 = vst.msk [vmem:[%s2490_s10 + $0x4] sm:$0xf] %vm1191_vm1, %v1919_v1  ;;  %v769_v7 = vadd.f32 %v2061_v5, %v2480_v34  ;;  %v633_v8 = vadd.f32 %v2480_v34, %v632_v6  ;;  %v760_v9 = vpop.f32.mrb[5].mxu1  ;;  %v2030_v10 = vpop.f32.mrb[6].mxu0 }
  0xf7   : > { %1225 = vst.msk [vmem:[%s2490_s10 + $0x84] sm:$0xf] %vm1191_vm1, %v1951_v3  ;;  %v877_v11 = vmax.f32 %v641_v4, 0.0  ;;  %v761_v12 = vadd.f32 %v2480_v34, %v760_v9  ;;  %v644_v13 = vadd.f32 %v2030_v10, %v2480_v34  ;;  %v2062_v14 = vpop.f32.mrb[6].mxu1  ;;  %v635_v15 = vpop.f32.mrb[7].mxu0 }
  0xf8   : > { %v909_v16 = vmax.f32 %v769_v7, 0.0  ;;  %v875_v17 = vmax.f32 %v633_v8, 0.0  ;;  %v772_v18 = vadd.f32 %v2062_v14, %v2480_v34  ;;  %v636_v19 = vadd.f32 %v2480_v34, %v635_v15  ;;  %v763_v20 = vpop.f32.mrb[7].mxu1 }
  0xf9   : > { %v1924_v21 = vpack.c.bf16 %v877_v11, %v877_v11  ;;  %v907_v22 = vmax.f32 %v761_v12, 0.0  ;;  %v878_v23 = vmax.f32 %v644_v13, 0.0  ;;  %v764_v24 = vadd.f32 %v2480_v34, %v763_v20 }
  0xfa   : > { %v1956_v25 = vpack.c.bf16 %v909_v16, %v909_v16  ;;  %v1922_v26 = vpack.c.bf16 %v875_v17, %v875_v17  ;;  %v910_v27 = vmax.f32 %v772_v18, 0.0  ;;  %v876_v28 = vmax.f32 %v636_v19, 0.0 }
  0xfb   : > { %1198 = vst.msk [vmem:[%s2490_s10 + $0x18] sm:$0xf] %vm1191_vm1, %v1924_v21  ;;  %v1954_v29 = vpack.c.bf16 %v907_v22, %v907_v22  ;;  %v1925_v30 = vpack.c.bf16 %v878_v23, %v878_v23  ;;  %v908_v31 = vmax.f32 %v764_v24, 0.0 }
  0xfc   : > { %1230 = vst.msk [vmem:[%s2490_s10 + $0x98] sm:$0xf] %vm1191_vm1, %v1956_v25  ;;  %1196 = vst.msk [vmem:[%s2490_s10 + $0x10] sm:$0xf] %vm1191_vm1, %v1922_v26  ;;  %v1957_v32 = vpack.c.bf16 %v910_v27, %v910_v27  ;;  %v1923_v33 = vpack.c.bf16 %v876_v28, %v876_v28  ;;  %v2033_v35 = vpop.f32.mrb[8].mxu0 }
  0xfd   : > { %1228 = vst.msk [vmem:[%s2490_s10 + $0x90] sm:$0xf] %vm1191_vm1, %v1954_v29  ;;  %1199 = vst.msk [vmem:[%s2490_s10 + $0x1c] sm:$0xf] %vm1191_vm1, %v1925_v30  ;;  %v1955_v36 = vpack.c.bf16 %v908_v31, %v908_v31  ;;  %v657_v37 = vadd.f32 %v2033_v35, %v2480_v34  ;;  %v2065_v38 = vpop.f32.mrb[8].mxu1  ;;  %v648_v39 = vpop.f32.mrb[9].mxu0 }
  0xfe   : > { %1231 = vst.msk [vmem:[%s2490_s10 + $0x9c] sm:$0xf] %vm1191_vm1, %v1957_v32  ;;  %1197 = vst.msk [vmem:[%s2490_s10 + $0x14] sm:$0xf] %vm1191_vm1, %v1923_v33  ;;  %v785_v40 = vadd.f32 %v2065_v38, %v2480_v34  ;;  %v649_v41 = vadd.f32 %v2480_v34, %v648_v39  ;;  %v776_v42 = vpop.f32.mrb[9].mxu1  ;;  %v2034_v43 = vpop.f32.mrb[10].mxu0 }
  0xff   : > { %1229 = vst.msk [vmem:[%s2490_s10 + $0x94] sm:$0xf] %vm1191_vm1, %v1955_v36  ;;  %v881_v44 = vmax.f32 %v657_v37, 0.0  ;;  %v777_v45 = vadd.f32 %v2480_v34, %v776_v42  ;;  %v660_v46 = vadd.f32 %v2034_v43, %v2480_v34  ;;  %v2066_v47 = vpop.f32.mrb[10].mxu1  ;;  %v651_v48 = vpop.f32.mrb[11].mxu0 }
 0x100   : > { %v913_v49 = vmax.f32 %v785_v40, 0.0  ;;  %v879_v50 = vmax.f32 %v649_v41, 0.0  ;;  %v788_v51 = vadd.f32 %v2066_v47, %v2480_v34  ;;  %v652_v52 = vadd.f32 %v2480_v34, %v651_v48  ;;  %v779_v53 = vpop.f32.mrb[11].mxu1 }
 0x101   : > { %v1928_v54 = vpack.c.bf16 %v881_v44, %v881_v44  ;;  %v911_v55 = vmax.f32 %v777_v45, 0.0  ;;  %v882_v56 = vmax.f32 %v660_v46, 0.0  ;;  %v780_v57 = vadd.f32 %v2480_v34, %v779_v53 }
 0x102   : > { %v1960_v58 = vpack.c.bf16 %v913_v49, %v913_v49  ;;  %v1926_v59 = vpack.c.bf16 %v879_v50, %v879_v50  ;;  %v914_v60 = vmax.f32 %v788_v51, 0.0  ;;  %v880_v61 = vmax.f32 %v652_v52, 0.0 }
 0x103   : > { %1202 = vst.msk [vmem:[%s2490_s10 + $0x28] sm:$0xf] %vm1191_vm1, %v1928_v54  ;;  %v1958_v62 = vpack.c.bf16 %v911_v55, %v911_v55  ;;  %v1929_v63 = vpack.c.bf16 %v882_v56, %v882_v56  ;;  %v912_v0 = vmax.f32 %v780_v57, 0.0 }
 0x104   : > { %1234 = vst.msk [vmem:[%s2490_s10 + $0xa8] sm:$0xf] %vm1191_vm1, %v1960_v58  ;;  %1200 = vst.msk [vmem:[%s2490_s10 + $0x20] sm:$0xf] %vm1191_vm1, %v1926_v59  ;;  %v1961_v1 = vpack.c.bf16 %v914_v60, %v914_v60  ;;  %v1927_v2 = vpack.c.bf16 %v880_v61, %v880_v61  ;;  %v2037_v3 = vpop.f32.mrb[12].mxu0 }
 0x105   : > { %1232 = vst.msk [vmem:[%s2490_s10 + $0xa0] sm:$0xf] %vm1191_vm1, %v1958_v62  ;;  %1203 = vst.msk [vmem:[%s2490_s10 + $0x2c] sm:$0xf] %vm1191_vm1, %v1929_v63  ;;  %v1959_v4 = vpack.c.bf16 %v912_v0, %v912_v0  ;;  %v673_v5 = vadd.f32 %v2037_v3, %v2480_v34  ;;  %v2069_v6 = vpop.f32.mrb[12].mxu1  ;;  %v664_v7 = vpop.f32.mrb[13].mxu0 }
 0x106   : > { %1235 = vst.msk [vmem:[%s2490_s10 + $0xac] sm:$0xf] %vm1191_vm1, %v1961_v1  ;;  %1201 = vst.msk [vmem:[%s2490_s10 + $0x24] sm:$0xf] %vm1191_vm1, %v1927_v2  ;;  %v801_v8 = vadd.f32 %v2069_v6, %v2480_v34  ;;  %v665_v9 = vadd.f32 %v2480_v34, %v664_v7  ;;  %v792_v10 = vpop.f32.mrb[13].mxu1  ;;  %v2038_v11 = vpop.f32.mrb[14].mxu0 }
 0x107   : > { %1233 = vst.msk [vmem:[%s2490_s10 + $0xa4] sm:$0xf] %vm1191_vm1, %v1959_v4  ;;  %v885_v12 = vmax.f32 %v673_v5, 0.0  ;;  %v793_v13 = vadd.f32 %v2480_v34, %v792_v10  ;;  %v676_v14 = vadd.f32 %v2038_v11, %v2480_v34  ;;  %v2070_v15 = vpop.f32.mrb[14].mxu1  ;;  %v667_v16 = vpop.f32.mrb[15].mxu0 }
 0x108   : > { %v917_v17 = vmax.f32 %v801_v8, 0.0  ;;  %v883_v18 = vmax.f32 %v665_v9, 0.0  ;;  %v804_v19 = vadd.f32 %v2070_v15, %v2480_v34  ;;  %v668_v20 = vadd.f32 %v2480_v34, %v667_v16  ;;  %v795_v21 = vpop.f32.mrb[15].mxu1 }
 0x109   : > { %v1932_v22 = vpack.c.bf16 %v885_v12, %v885_v12  ;;  %v915_v23 = vmax.f32 %v793_v13, 0.0  ;;  %v886_v24 = vmax.f32 %v676_v14, 0.0  ;;  %v796_v25 = vadd.f32 %v2480_v34, %v795_v21 }
 0x10a   : > { %v1964_v26 = vpack.c.bf16 %v917_v17, %v917_v17  ;;  %v1930_v27 = vpack.c.bf16 %v883_v18, %v883_v18  ;;  %v918_v28 = vmax.f32 %v804_v19, 0.0  ;;  %v884_v29 = vmax.f32 %v668_v20, 0.0 }
 0x10b   : > { %1206 = vst.msk [vmem:[%s2490_s10 + $0x38] sm:$0xf] %vm1191_vm1, %v1932_v22  ;;  %v1962_v30 = vpack.c.bf16 %v915_v23, %v915_v23  ;;  %v1933_v31 = vpack.c.bf16 %v886_v24, %v886_v24  ;;  %v916_v32 = vmax.f32 %v796_v25, 0.0 }
 0x10c   : > { %1238 = vst.msk [vmem:[%s2490_s10 + $0xb8] sm:$0xf] %vm1191_vm1, %v1964_v26  ;;  %1204 = vst.msk [vmem:[%s2490_s10 + $0x30] sm:$0xf] %vm1191_vm1, %v1930_v27  ;;  %v1965_v33 = vpack.c.bf16 %v918_v28, %v918_v28  ;;  %v1931_v35 = vpack.c.bf16 %v884_v29, %v884_v29  ;;  %v2041_v36 = vpop.f32.mrb[16].mxu0 }
 0x10d   : > { %1236 = vst.msk [vmem:[%s2490_s10 + $0xb0] sm:$0xf] %vm1191_vm1, %v1962_v30  ;;  %1207 = vst.msk [vmem:[%s2490_s10 + $0x3c] sm:$0xf] %vm1191_vm1, %v1933_v31  ;;  %v1963_v37 = vpack.c.bf16 %v916_v32, %v916_v32  ;;  %v689_v38 = vadd.f32 %v2041_v36, %v2480_v34  ;;  %v2073_v39 = vpop.f32.mrb[16].mxu1  ;;  %v680_v40 = vpop.f32.mrb[17].mxu0 }
 0x10e   : > { %1239 = vst.msk [vmem:[%s2490_s10 + $0xbc] sm:$0xf] %vm1191_vm1, %v1965_v33  ;;  %1205 = vst.msk [vmem:[%s2490_s10 + $0x34] sm:$0xf] %vm1191_vm1, %v1931_v35  ;;  %v817_v41 = vadd.f32 %v2073_v39, %v2480_v34  ;;  %v681_v42 = vadd.f32 %v2480_v34, %v680_v40  ;;  %v808_v43 = vpop.f32.mrb[17].mxu1  ;;  %v2042_v44 = vpop.f32.mrb[18].mxu0 }
 0x10f   : > { %1237 = vst.msk [vmem:[%s2490_s10 + $0xb4] sm:$0xf] %vm1191_vm1, %v1963_v37  ;;  %v889_v45 = vmax.f32 %v689_v38, 0.0  ;;  %v809_v46 = vadd.f32 %v2480_v34, %v808_v43  ;;  %v692_v47 = vadd.f32 %v2042_v44, %v2480_v34  ;;  %v2074_v48 = vpop.f32.mrb[18].mxu1  ;;  %v683_v49 = vpop.f32.mrb[19].mxu0 }
 0x110   : > { %v921_v50 = vmax.f32 %v817_v41, 0.0  ;;  %v887_v51 = vmax.f32 %v681_v42, 0.0  ;;  %v820_v52 = vadd.f32 %v2074_v48, %v2480_v34  ;;  %v684_v53 = vadd.f32 %v2480_v34, %v683_v49  ;;  %v811_v54 = vpop.f32.mrb[19].mxu1 }
 0x111   : > { %v1936_v55 = vpack.c.bf16 %v889_v45, %v889_v45  ;;  %v919_v56 = vmax.f32 %v809_v46, 0.0  ;;  %v890_v57 = vmax.f32 %v692_v47, 0.0  ;;  %v812_v58 = vadd.f32 %v2480_v34, %v811_v54 }
 0x112   : > { %v1968_v59 = vpack.c.bf16 %v921_v50, %v921_v50  ;;  %v1934_v60 = vpack.c.bf16 %v887_v51, %v887_v51  ;;  %v922_v61 = vmax.f32 %v820_v52, 0.0  ;;  %v888_v62 = vmax.f32 %v684_v53, 0.0 }
 0x113   : > { %1210 = vst.msk [vmem:[%s2490_s10 + $0x48] sm:$0xf] %vm1191_vm1, %v1936_v55  ;;  %v1966_v63 = vpack.c.bf16 %v919_v56, %v919_v56  ;;  %v1937_v0 = vpack.c.bf16 %v890_v57, %v890_v57  ;;  %v920_v1 = vmax.f32 %v812_v58, 0.0 }
 0x114   : > { %1242 = vst.msk [vmem:[%s2490_s10 + $0xc8] sm:$0xf] %vm1191_vm1, %v1968_v59  ;;  %1208 = vst.msk [vmem:[%s2490_s10 + $0x40] sm:$0xf] %vm1191_vm1, %v1934_v60  ;;  %v1969_v2 = vpack.c.bf16 %v922_v61, %v922_v61  ;;  %v1935_v3 = vpack.c.bf16 %v888_v62, %v888_v62  ;;  %v2045_v4 = vpop.f32.mrb[20].mxu0 }
 0x115   : > { %1240 = vst.msk [vmem:[%s2490_s10 + $0xc0] sm:$0xf] %vm1191_vm1, %v1966_v63  ;;  %1211 = vst.msk [vmem:[%s2490_s10 + $0x4c] sm:$0xf] %vm1191_vm1, %v1937_v0  ;;  %v1967_v5 = vpack.c.bf16 %v920_v1, %v920_v1  ;;  %v705_v6 = vadd.f32 %v2045_v4, %v2480_v34  ;;  %v2077_v7 = vpop.f32.mrb[20].mxu1  ;;  %v696_v8 = vpop.f32.mrb[21].mxu0 }
 0x116   : > { %1243 = vst.msk [vmem:[%s2490_s10 + $0xcc] sm:$0xf] %vm1191_vm1, %v1969_v2  ;;  %1209 = vst.msk [vmem:[%s2490_s10 + $0x44] sm:$0xf] %vm1191_vm1, %v1935_v3  ;;  %v833_v9 = vadd.f32 %v2077_v7, %v2480_v34  ;;  %v697_v10 = vadd.f32 %v2480_v34, %v696_v8  ;;  %v824_v11 = vpop.f32.mrb[21].mxu1  ;;  %v2046_v12 = vpop.f32.mrb[22].mxu0 }
 0x117   : > { %1241 = vst.msk [vmem:[%s2490_s10 + $0xc4] sm:$0xf] %vm1191_vm1, %v1967_v5  ;;  %v893_v13 = vmax.f32 %v705_v6, 0.0  ;;  %v825_v14 = vadd.f32 %v2480_v34, %v824_v11  ;;  %v708_v15 = vadd.f32 %v2046_v12, %v2480_v34  ;;  %v2078_v16 = vpop.f32.mrb[22].mxu1  ;;  %v699_v17 = vpop.f32.mrb[23].mxu0 }
 0x118   : > { %v925_v18 = vmax.f32 %v833_v9, 0.0  ;;  %v891_v19 = vmax.f32 %v697_v10, 0.0  ;;  %v836_v20 = vadd.f32 %v2078_v16, %v2480_v34  ;;  %v700_v21 = vadd.f32 %v2480_v34, %v699_v17  ;;  %v827_v22 = vpop.f32.mrb[23].mxu1 }
 0x119   : > { %v1940_v23 = vpack.c.bf16 %v893_v13, %v893_v13  ;;  %v923_v24 = vmax.f32 %v825_v14, 0.0  ;;  %v894_v25 = vmax.f32 %v708_v15, 0.0  ;;  %v828_v26 = vadd.f32 %v2480_v34, %v827_v22 }
 0x11a   : > { %v1972_v27 = vpack.c.bf16 %v925_v18, %v925_v18  ;;  %v1938_v28 = vpack.c.bf16 %v891_v19, %v891_v19  ;;  %v926_v29 = vmax.f32 %v836_v20, 0.0  ;;  %v892_v30 = vmax.f32 %v700_v21, 0.0 }
 0x11b   : > { %1214 = vst.msk [vmem:[%s2490_s10 + $0x58] sm:$0xf] %vm1191_vm1, %v1940_v23  ;;  %v1970_v31 = vpack.c.bf16 %v923_v24, %v923_v24  ;;  %v1941_v32 = vpack.c.bf16 %v894_v25, %v894_v25  ;;  %v924_v33 = vmax.f32 %v828_v26, 0.0 }
 0x11c   : > { %1246 = vst.msk [vmem:[%s2490_s10 + $0xd8] sm:$0xf] %vm1191_vm1, %v1972_v27  ;;  %1212 = vst.msk [vmem:[%s2490_s10 + $0x50] sm:$0xf] %vm1191_vm1, %v1938_v28  ;;  %v1973_v35 = vpack.c.bf16 %v926_v29, %v926_v29  ;;  %v1939_v36 = vpack.c.bf16 %v892_v30, %v892_v30  ;;  %v2049_v37 = vpop.f32.mrb[24].mxu0 }
 0x11d   : > { %1244 = vst.msk [vmem:[%s2490_s10 + $0xd0] sm:$0xf] %vm1191_vm1, %v1970_v31  ;;  %1215 = vst.msk [vmem:[%s2490_s10 + $0x5c] sm:$0xf] %vm1191_vm1, %v1941_v32  ;;  %v1971_v38 = vpack.c.bf16 %v924_v33, %v924_v33  ;;  %v721_v39 = vadd.f32 %v2049_v37, %v2480_v34  ;;  %v2081_v40 = vpop.f32.mrb[24].mxu1  ;;  %v712_v41 = vpop.f32.mrb[25].mxu0 }
 0x11e   : > { %1247 = vst.msk [vmem:[%s2490_s10 + $0xdc] sm:$0xf] %vm1191_vm1, %v1973_v35  ;;  %1213 = vst.msk [vmem:[%s2490_s10 + $0x54] sm:$0xf] %vm1191_vm1, %v1939_v36  ;;  %v849_v42 = vadd.f32 %v2081_v40, %v2480_v34  ;;  %v713_v43 = vadd.f32 %v2480_v34, %v712_v41  ;;  %v840_v44 = vpop.f32.mrb[25].mxu1  ;;  %v2050_v45 = vpop.f32.mrb[26].mxu0 }
 0x11f   : > { %1245 = vst.msk [vmem:[%s2490_s10 + $0xd4] sm:$0xf] %vm1191_vm1, %v1971_v38  ;;  %v897_v46 = vmax.f32 %v721_v39, 0.0  ;;  %v841_v47 = vadd.f32 %v2480_v34, %v840_v44  ;;  %v724_v48 = vadd.f32 %v2050_v45, %v2480_v34  ;;  %v2082_v49 = vpop.f32.mrb[26].mxu1  ;;  %v715_v50 = vpop.f32.mrb[27].mxu0 }
 0x120   : > { %v929_v51 = vmax.f32 %v849_v42, 0.0  ;;  %v895_v52 = vmax.f32 %v713_v43, 0.0  ;;  %v852_v53 = vadd.f32 %v2082_v49, %v2480_v34  ;;  %v716_v54 = vadd.f32 %v2480_v34, %v715_v50  ;;  %v843_v55 = vpop.f32.mrb[27].mxu1 }
 0x121   : > { %v1944_v56 = vpack.c.bf16 %v897_v46, %v897_v46  ;;  %v927_v57 = vmax.f32 %v841_v47, 0.0  ;;  %v898_v58 = vmax.f32 %v724_v48, 0.0  ;;  %v844_v59 = vadd.f32 %v2480_v34, %v843_v55 }
 0x122   : > { %v1976_v60 = vpack.c.bf16 %v929_v51, %v929_v51  ;;  %v1942_v61 = vpack.c.bf16 %v895_v52, %v895_v52  ;;  %v930_v62 = vmax.f32 %v852_v53, 0.0  ;;  %v896_v63 = vmax.f32 %v716_v54, 0.0 }
 0x123   : > { %1218 = vst.msk [vmem:[%s2490_s10 + $0x68] sm:$0xf] %vm1191_vm1, %v1944_v56  ;;  %v1974_v0 = vpack.c.bf16 %v927_v57, %v927_v57  ;;  %v1945_v1 = vpack.c.bf16 %v898_v58, %v898_v58  ;;  %v928_v2 = vmax.f32 %v844_v59, 0.0 }
 0x124   : > { %1250 = vst.msk [vmem:[%s2490_s10 + $0xe8] sm:$0xf] %vm1191_vm1, %v1976_v60  ;;  %1216 = vst.msk [vmem:[%s2490_s10 + $0x60] sm:$0xf] %vm1191_vm1, %v1942_v61  ;;  %v1977_v3 = vpack.c.bf16 %v930_v62, %v930_v62  ;;  %v1943_v4 = vpack.c.bf16 %v896_v63, %v896_v63  ;;  %v2053_v5 = vpop.f32.mrb[28].mxu0 }
 0x125   : > { %1248 = vst.msk [vmem:[%s2490_s10 + $0xe0] sm:$0xf] %vm1191_vm1, %v1974_v0  ;;  %1219 = vst.msk [vmem:[%s2490_s10 + $0x6c] sm:$0xf] %vm1191_vm1, %v1945_v1  ;;  %v1975_v6 = vpack.c.bf16 %v928_v2, %v928_v2  ;;  %v737_v7 = vadd.f32 %v2053_v5, %v2480_v34  ;;  %v2085_v8 = vpop.f32.mrb[28].mxu1  ;;  %v728_v9 = vpop.f32.mrb[29].mxu0 }
 0x126   : > { %1251 = vst.msk [vmem:[%s2490_s10 + $0xec] sm:$0xf] %vm1191_vm1, %v1977_v3  ;;  %1217 = vst.msk [vmem:[%s2490_s10 + $0x64] sm:$0xf] %vm1191_vm1, %v1943_v4  ;;  %v865_v10 = vadd.f32 %v2085_v8, %v2480_v34  ;;  %v729_v11 = vadd.f32 %v2480_v34, %v728_v9  ;;  %v856_v12 = vpop.f32.mrb[29].mxu1  ;;  %v2054_v13 = vpop.f32.mrb[30].mxu0 }
 0x127   : > { %1249 = vst.msk [vmem:[%s2490_s10 + $0xe4] sm:$0xf] %vm1191_vm1, %v1975_v6  ;;  %v901_v14 = vmax.f32 %v737_v7, 0.0  ;;  %v857_v15 = vadd.f32 %v2480_v34, %v856_v12  ;;  %v740_v16 = vadd.f32 %v2054_v13, %v2480_v34  ;;  %v2086_v17 = vpop.f32.mrb[30].mxu1  ;;  %v731_v18 = vpop.f32.mrb[31].mxu0 }
 0x128   : > { %v933_v19 = vmax.f32 %v865_v10, 0.0  ;;  %v899_v20 = vmax.f32 %v729_v11, 0.0  ;;  %v868_v21 = vadd.f32 %v2086_v17, %v2480_v34  ;;  %v732_v22 = vadd.f32 %v2480_v34, %v731_v18  ;;  %v859_v23 = vpop.f32.mrb[31].mxu1 }
 0x129   : > { %v1948_v24 = vpack.c.bf16 %v901_v14, %v901_v14  ;;  %v931_v25 = vmax.f32 %v857_v15, 0.0  ;;  %v902_v26 = vmax.f32 %v740_v16, 0.0  ;;  %v860_v27 = vadd.f32 %v2480_v34, %v859_v23  ;;  %1262 = sbr.rel (!%p2385_p3) target bundleno = 395 (0x18b), region = 36 }
 0x12a   : > { %v1980_v28 = vpack.c.bf16 %v933_v19, %v933_v19  ;;  %v1946_v29 = vpack.c.bf16 %v899_v20, %v899_v20  ;;  %v934_v30 = vmax.f32 %v868_v21, 0.0  ;;  %v900_v31 = vmax.f32 %v732_v22, 0.0 }
 0x12b   : > { %1222 = vst.msk [vmem:[%s2490_s10 + $0x78] sm:$0xf] %vm1191_vm1, %v1948_v24  ;;  %v1978_v32 = vpack.c.bf16 %v931_v25, %v931_v25  ;;  %v1949_v33 = vpack.c.bf16 %v902_v26, %v902_v26  ;;  %v932_v35 = vmax.f32 %v860_v27, 0.0 }
 0x12c   : > { %1254 = vst.msk [vmem:[%s2490_s10 + $0xf8] sm:$0xf] %vm1191_vm1, %v1980_v28  ;;  %1220 = vst.msk [vmem:[%s2490_s10 + $0x70] sm:$0xf] %vm1191_vm1, %v1946_v29  ;;  %v1981_v36 = vpack.c.bf16 %v934_v30, %v934_v30  ;;  %v1947_v37 = vpack.c.bf16 %v900_v31, %v900_v31 }
 0x12d   : > { %1252 = vst.msk [vmem:[%s2490_s10 + $0xf0] sm:$0xf] %vm1191_vm1, %v1978_v32  ;;  %1223 = vst.msk [vmem:[%s2490_s10 + $0x7c] sm:$0xf] %vm1191_vm1, %v1949_v33  ;;  %v1979_v34 = vpack.c.bf16 %v932_v35, %v932_v35 }
 0x12e   : > { %1255 = vst.msk [vmem:[%s2490_s10 + $0xfc] sm:$0xf] %vm1191_vm1, %v1981_v36  ;;  %1221 = vst.msk [vmem:[%s2490_s10 + $0x74] sm:$0xf] %vm1191_vm1, %v1947_v37 }
 0x12f   : > { %1253 = vst.msk [vmem:[%s2490_s10 + $0xf4] sm:$0xf] %vm1191_vm1, %v1979_v34 }
 0x130   : > { %s2895_s11 = smov (!%p1265_p9, %s1264_s11), 64 }
 0x131   : > { %s1903_s23 = sshll.u32 %s2895_s11, 6 }
 0x132   : > { %p1906_p10 = scmp.eq.s32.totalorder %s1903_s23, 0 }
 0x133   : > { %s2689_s24 = sshrl.u32 (!%p1906_p10), %s2895_s11, 6 }
 0x134   : > { %1274 = sbr.rel (%p1906_p10) target bundleno = 395 (0x18b), region = 40  ;;  %p1907_p11 = scmp.le.s32.totalorder (!%p1906_p10), %s2689_s24, 0 }
 0x13b   : > { %1690 = sbr.rel (%p1907_p11) target bundleno = 374 (0x176), region = 118  ;;  %s2885_s14 = smov (!%p1907_p11), %s2683_s21 }
 0x13c   : > { %s2886_s20 = smov (!%p1907_p11), %s2490_s10  ;;  %s2698_s25 = smov (!%p1907_p11), 0  }
 0x13d   : > { %s2700_s26 = smov (!%p1907_p11), 0  }
 0x142 LB: >> { %v1290_v38 = vld [vmem:[%s2307_s20] sm:$0xf]  ;;  %v1292_v39 = vld [vmem:[%s2307_s20 + $0x4] sm:$0xf]  ;;  %v1294_v40 = vld [vmem:[%s2307_s20 + $0x8] sm:$0xf]  ;;  %s2315_s26 = sphi %s2700_s26, %s1284_s26   ;;  %s2311_s25 = sphi %s2698_s25, %s2887_s25   ;;  %s2307_s20 = sphi %s2886_s20, %s1423_s20   ;;  %s2303_s14 = sphi %s2885_s14, %s1424_s14  }
 0x143   : >> { %1291 = vst [vmem:[%s2303_s14] sm:$0xf] %v1290_v38  ;;  %1293 = vst [vmem:[%s2303_s14 + $0x4] sm:$0xf] %v1292_v39  ;;  %v1296_v41 = vld [vmem:[%s2307_s20 + $0xc] sm:$0xf]  ;;  %s1418_s27 = sadd.s32 1, %s2311_s25 }
 0x144   : >> { %1295 = vst [vmem:[%s2303_s14 + $0x8] sm:$0xf] %v1294_v40  ;;  %v1298_v42 = vld [vmem:[%s2307_s20 + $0x10] sm:$0xf]  ;;  %v1300_v43 = vld [vmem:[%s2307_s20 + $0x14] sm:$0xf]  ;;  %p1419_p12 = scmp.ge.s32.totalorder %s1418_s27, %s2689_s24 }
 0x145   : >> { %1297 = vst [vmem:[%s2303_s14 + $0xc] sm:$0xf] %v1296_v41  ;;  %1299 = vst [vmem:[%s2303_s14 + $0x10] sm:$0xf] %v1298_v42  ;;  %v1302_v44 = vld [vmem:[%s2307_s20 + $0x18] sm:$0xf] }
 0x146   : >> { %1301 = vst [vmem:[%s2303_s14 + $0x14] sm:$0xf] %v1300_v43  ;;  %v1304_v45 = vld [vmem:[%s2307_s20 + $0x1c] sm:$0xf]  ;;  %v1306_v46 = vld [vmem:[%s2307_s20 + $0x20] sm:$0xf] }
 0x147   : >> { %1303 = vst [vmem:[%s2303_s14 + $0x18] sm:$0xf] %v1302_v44  ;;  %1305 = vst [vmem:[%s2303_s14 + $0x1c] sm:$0xf] %v1304_v45  ;;  %v1308_v47 = vld [vmem:[%s2307_s20 + $0x24] sm:$0xf] }
 0x148   : >> { %1307 = vst [vmem:[%s2303_s14 + $0x20] sm:$0xf] %v1306_v46  ;;  %v1310_v48 = vld [vmem:[%s2307_s20 + $0x28] sm:$0xf]  ;;  %v1312_v49 = vld [vmem:[%s2307_s20 + $0x2c] sm:$0xf] }
 0x149   : >> { %1309 = vst [vmem:[%s2303_s14 + $0x24] sm:$0xf] %v1308_v47  ;;  %1311 = vst [vmem:[%s2303_s14 + $0x28] sm:$0xf] %v1310_v48  ;;  %v1314_v50 = vld [vmem:[%s2307_s20 + $0x30] sm:$0xf] }
 0x14a   : >> { %1313 = vst [vmem:[%s2303_s14 + $0x2c] sm:$0xf] %v1312_v49  ;;  %v1316_v51 = vld [vmem:[%s2307_s20 + $0x34] sm:$0xf]  ;;  %v1318_v52 = vld [vmem:[%s2307_s20 + $0x38] sm:$0xf] }
 0x14b   : >> { %1315 = vst [vmem:[%s2303_s14 + $0x30] sm:$0xf] %v1314_v50  ;;  %1317 = vst [vmem:[%s2303_s14 + $0x34] sm:$0xf] %v1316_v51  ;;  %v1320_v53 = vld [vmem:[%s2307_s20 + $0x3c] sm:$0xf] }
 0x14c   : >> { %1319 = vst [vmem:[%s2303_s14 + $0x38] sm:$0xf] %v1318_v52  ;;  %v1322_v54 = vld [vmem:[%s2307_s20 + $0x40] sm:$0xf]  ;;  %v1324_v55 = vld [vmem:[%s2307_s20 + $0x44] sm:$0xf] }
 0x14d   : >> { %1321 = vst [vmem:[%s2303_s14 + $0x3c] sm:$0xf] %v1320_v53  ;;  %1323 = vst [vmem:[%s2303_s14 + $0x40] sm:$0xf] %v1322_v54  ;;  %v1326_v56 = vld [vmem:[%s2307_s20 + $0x48] sm:$0xf] }
 0x14e   : >> { %1325 = vst [vmem:[%s2303_s14 + $0x44] sm:$0xf] %v1324_v55  ;;  %v1328_v57 = vld [vmem:[%s2307_s20 + $0x4c] sm:$0xf]  ;;  %v1330_v58 = vld [vmem:[%s2307_s20 + $0x50] sm:$0xf] }
 0x14f   : >> { %1327 = vst [vmem:[%s2303_s14 + $0x48] sm:$0xf] %v1326_v56  ;;  %1329 = vst [vmem:[%s2303_s14 + $0x4c] sm:$0xf] %v1328_v57  ;;  %v1332_v59 = vld [vmem:[%s2307_s20 + $0x54] sm:$0xf] }
 0x150   : >> { %1331 = vst [vmem:[%s2303_s14 + $0x50] sm:$0xf] %v1330_v58  ;;  %v1334_v60 = vld [vmem:[%s2307_s20 + $0x58] sm:$0xf]  ;;  %v1336_v61 = vld [vmem:[%s2307_s20 + $0x5c] sm:$0xf] }
 0x151   : >> { %1333 = vst [vmem:[%s2303_s14 + $0x54] sm:$0xf] %v1332_v59  ;;  %1335 = vst [vmem:[%s2303_s14 + $0x58] sm:$0xf] %v1334_v60  ;;  %v1338_v62 = vld [vmem:[%s2307_s20 + $0x60] sm:$0xf] }
 0x152   : >> { %1337 = vst [vmem:[%s2303_s14 + $0x5c] sm:$0xf] %v1336_v61  ;;  %v1340_v63 = vld [vmem:[%s2307_s20 + $0x64] sm:$0xf]  ;;  %v1342_v0 = vld [vmem:[%s2307_s20 + $0x68] sm:$0xf] }
 0x153   : >> { %1339 = vst [vmem:[%s2303_s14 + $0x60] sm:$0xf] %v1338_v62  ;;  %1341 = vst [vmem:[%s2303_s14 + $0x64] sm:$0xf] %v1340_v63  ;;  %v1344_v1 = vld [vmem:[%s2307_s20 + $0x6c] sm:$0xf] }
 0x154   : >> { %1343 = vst [vmem:[%s2303_s14 + $0x68] sm:$0xf] %v1342_v0  ;;  %v1346_v2 = vld [vmem:[%s2307_s20 + $0x70] sm:$0xf]  ;;  %v1348_v3 = vld [vmem:[%s2307_s20 + $0x74] sm:$0xf] }
 0x155   : >> { %1345 = vst [vmem:[%s2303_s14 + $0x6c] sm:$0xf] %v1344_v1  ;;  %1347 = vst [vmem:[%s2303_s14 + $0x70] sm:$0xf] %v1346_v2  ;;  %v1350_v4 = vld [vmem:[%s2307_s20 + $0x78] sm:$0xf] }
 0x156   : >> { %1349 = vst [vmem:[%s2303_s14 + $0x74] sm:$0xf] %v1348_v3  ;;  %v1352_v5 = vld [vmem:[%s2307_s20 + $0x7c] sm:$0xf]  ;;  %v1354_v6 = vld [vmem:[%s2307_s20 + $0x80] sm:$0xf] }
 0x157   : >> { %1351 = vst [vmem:[%s2303_s14 + $0x78] sm:$0xf] %v1350_v4  ;;  %1353 = vst [vmem:[%s2303_s14 + $0x7c] sm:$0xf] %v1352_v5  ;;  %v1356_v7 = vld [vmem:[%s2307_s20 + $0x84] sm:$0xf] }
 0x158   : >> { %1355 = vst [vmem:[%s2303_s14 + $0x80] sm:$0xf] %v1354_v6  ;;  %v1358_v8 = vld [vmem:[%s2307_s20 + $0x88] sm:$0xf]  ;;  %v1360_v9 = vld [vmem:[%s2307_s20 + $0x8c] sm:$0xf] }
 0x159   : >> { %1357 = vst [vmem:[%s2303_s14 + $0x84] sm:$0xf] %v1356_v7  ;;  %1359 = vst [vmem:[%s2303_s14 + $0x88] sm:$0xf] %v1358_v8  ;;  %v1362_v10 = vld [vmem:[%s2307_s20 + $0x90] sm:$0xf] }
 0x15a   : >> { %1361 = vst [vmem:[%s2303_s14 + $0x8c] sm:$0xf] %v1360_v9  ;;  %v1364_v11 = vld [vmem:[%s2307_s20 + $0x94] sm:$0xf]  ;;  %v1366_v12 = vld [vmem:[%s2307_s20 + $0x98] sm:$0xf] }
 0x15b   : >> { %1363 = vst [vmem:[%s2303_s14 + $0x90] sm:$0xf] %v1362_v10  ;;  %1365 = vst [vmem:[%s2303_s14 + $0x94] sm:$0xf] %v1364_v11  ;;  %v1368_v13 = vld [vmem:[%s2307_s20 + $0x9c] sm:$0xf] }
 0x15c   : >> { %1367 = vst [vmem:[%s2303_s14 + $0x98] sm:$0xf] %v1366_v12  ;;  %v1370_v14 = vld [vmem:[%s2307_s20 + $0xa0] sm:$0xf]  ;;  %v1372_v15 = vld [vmem:[%s2307_s20 + $0xa4] sm:$0xf] }
 0x15d   : >> { %1369 = vst [vmem:[%s2303_s14 + $0x9c] sm:$0xf] %v1368_v13  ;;  %1371 = vst [vmem:[%s2303_s14 + $0xa0] sm:$0xf] %v1370_v14  ;;  %v1374_v16 = vld [vmem:[%s2307_s20 + $0xa8] sm:$0xf] }
 0x15e   : >> { %1373 = vst [vmem:[%s2303_s14 + $0xa4] sm:$0xf] %v1372_v15  ;;  %v1376_v17 = vld [vmem:[%s2307_s20 + $0xac] sm:$0xf]  ;;  %v1378_v18 = vld [vmem:[%s2307_s20 + $0xb0] sm:$0xf] }
 0x15f   : >> { %1375 = vst [vmem:[%s2303_s14 + $0xa8] sm:$0xf] %v1374_v16  ;;  %1377 = vst [vmem:[%s2303_s14 + $0xac] sm:$0xf] %v1376_v17  ;;  %v1380_v19 = vld [vmem:[%s2307_s20 + $0xb4] sm:$0xf] }
 0x160   : >> { %1379 = vst [vmem:[%s2303_s14 + $0xb0] sm:$0xf] %v1378_v18  ;;  %v1382_v20 = vld [vmem:[%s2307_s20 + $0xb8] sm:$0xf]  ;;  %v1384_v21 = vld [vmem:[%s2307_s20 + $0xbc] sm:$0xf] }
 0x161   : >> { %1381 = vst [vmem:[%s2303_s14 + $0xb4] sm:$0xf] %v1380_v19  ;;  %1383 = vst [vmem:[%s2303_s14 + $0xb8] sm:$0xf] %v1382_v20  ;;  %v1386_v22 = vld [vmem:[%s2307_s20 + $0xc0] sm:$0xf] }
 0x162   : >> { %1385 = vst [vmem:[%s2303_s14 + $0xbc] sm:$0xf] %v1384_v21  ;;  %v1388_v23 = vld [vmem:[%s2307_s20 + $0xc4] sm:$0xf]  ;;  %v1390_v24 = vld [vmem:[%s2307_s20 + $0xc8] sm:$0xf] }
 0x163   : >> { %1387 = vst [vmem:[%s2303_s14 + $0xc0] sm:$0xf] %v1386_v22  ;;  %1389 = vst [vmem:[%s2303_s14 + $0xc4] sm:$0xf] %v1388_v23  ;;  %v1392_v25 = vld [vmem:[%s2307_s20 + $0xcc] sm:$0xf] }
 0x164   : >> { %1391 = vst [vmem:[%s2303_s14 + $0xc8] sm:$0xf] %v1390_v24  ;;  %v1394_v26 = vld [vmem:[%s2307_s20 + $0xd0] sm:$0xf]  ;;  %v1396_v27 = vld [vmem:[%s2307_s20 + $0xd4] sm:$0xf] }
 0x165   : >> { %1393 = vst [vmem:[%s2303_s14 + $0xcc] sm:$0xf] %v1392_v25  ;;  %1395 = vst [vmem:[%s2303_s14 + $0xd0] sm:$0xf] %v1394_v26  ;;  %v1398_v28 = vld [vmem:[%s2307_s20 + $0xd8] sm:$0xf] }
 0x166   : >> { %1397 = vst [vmem:[%s2303_s14 + $0xd4] sm:$0xf] %v1396_v27  ;;  %v1400_v29 = vld [vmem:[%s2307_s20 + $0xdc] sm:$0xf]  ;;  %v1402_v30 = vld [vmem:[%s2307_s20 + $0xe0] sm:$0xf] }
 0x167   : >> { %1399 = vst [vmem:[%s2303_s14 + $0xd8] sm:$0xf] %v1398_v28  ;;  %1401 = vst [vmem:[%s2303_s14 + $0xdc] sm:$0xf] %v1400_v29  ;;  %v1404_v31 = vld [vmem:[%s2307_s20 + $0xe4] sm:$0xf] }
 0x168   : >> { %1403 = vst [vmem:[%s2303_s14 + $0xe0] sm:$0xf] %v1402_v30  ;;  %v1406_v32 = vld [vmem:[%s2307_s20 + $0xe8] sm:$0xf]  ;;  %v1408_v33 = vld [vmem:[%s2307_s20 + $0xec] sm:$0xf] }
 0x169   : >> { %1405 = vst [vmem:[%s2303_s14 + $0xe4] sm:$0xf] %v1404_v31  ;;  %1407 = vst [vmem:[%s2303_s14 + $0xe8] sm:$0xf] %v1406_v32  ;;  %v1410_v35 = vld [vmem:[%s2307_s20 + $0xf0] sm:$0xf] }
 0x16a   : >> { %1409 = vst [vmem:[%s2303_s14 + $0xec] sm:$0xf] %v1408_v33  ;;  %v1412_v36 = vld [vmem:[%s2307_s20 + $0xf4] sm:$0xf]  ;;  %v1414_v37 = vld [vmem:[%s2307_s20 + $0xf8] sm:$0xf] }
 0x16b   : >> { %1411 = vst [vmem:[%s2303_s14 + $0xf0] sm:$0xf] %v1410_v35  ;;  %1413 = vst [vmem:[%s2303_s14 + $0xf4] sm:$0xf] %v1412_v36  ;;  %v1416_v34 = vld [vmem:[%s2307_s20 + $0xfc] sm:$0xf] }
 0x16c   : >> { %1415 = vst [vmem:[%s2303_s14 + $0xf8] sm:$0xf] %v1414_v37  ;;  %1417 = vst [vmem:[%s2303_s14 + $0xfc] sm:$0xf] %v1416_v34  ;;  %s2897_s27 = smov (%p1419_p12, %s1418_s27), 0  ;;  %s1284_s26 = sadd.s32 1, %s2315_s26  }
 0x16d   : >> { %s1908_s28 = sshll.u32 %s2897_s27, 8  ;;  %p1283_p13 = scmp.ge.s32.totalorder %s1284_s26, %s2689_s24 }
 0x16e   : >> { %s1423_s20 = scalar_lea.vmem %s2490_s10, %s1908_s28 [#allocation2]   ;;  %s1424_s14 = scalar_lea.vmem %s2683_s21, %s1908_s28  }
 0x16f   : >> { %s2887_s25 = smov %s2897_s27  ;;  %1286 = sbr.rel (!%p1283_p13) target bundleno = 322 (0x142), region = 124 }
 0x176 PF: > { %s2857_s29 = sand.u32 63, %s2895_s11   ;;  %s1983_s30 = sshll.u32 %s2689_s24, 8 }
 0x177   : > { %s1429_s4 = scalar_lea.vmem %s2490_s10, %s1983_s30 [#allocation2]   ;;  %s1431_s5 = scalar_lea.vmem %s2683_s21, %s1983_s30  }
 0x178   : > { %p1913_p0 = scmp.le.s32.totalorder %s2857_s29, 0 }
 0x179   : > { %s2317_s6 = smov (!%p1913_p0), %s1431_s5   ;;  %s2321_s7 = smov (!%p1913_p0), %s1429_s4  }
 0x17a   : > { %1704 = sbr.rel (%p1913_p0) target bundleno = 395 (0x18b), region = 129  ;;  %s2325_s8 = smov (!%p1913_p0), 0  }
 0x17b   : > { %s2329_s9 = smov (!%p1913_p0), 0  }
 0x181 LB: >> { %v1441_v38 = vld [vmem:[%s2323_s7] sm:$0xf]  ;;  %s1443_s11 = sadd.s32 1, %s2327_s8  ;;  %s1435_s9 = sadd.s32 1, %s2331_s9   ;;  %s2331_s9 = sphi %s2329_s9, %s1435_s9   ;;  %s2327_s8 = sphi %s2325_s8, %s2326_s8   ;;  %s2323_s7 = sphi %s2321_s7, %s1448_s7   ;;  %s2319_s6 = sphi %s2317_s6, %s1449_s6  }
 0x182   : >> { %1442 = vst [vmem:[%s2319_s6] sm:$0xf] %v1441_v38  ;;  %p1444_p1 = scmp.ge.s32.totalorder %s1443_s11, %s2857_s29  ;;  %p1434_p2 = scmp.ge.s32.totalorder %s1435_s9, %s2857_s29 }
 0x184   : >> { %s2899_s11 = smov (%p1444_p1, %s1443_s11), 0  ;;  %1437 = sbr.rel (!%p1434_p2) target bundleno = 385 (0x181), region = 135 }
 0x185   : >> { %s1914_s10 = sshll.u32 %s2899_s11, 2  ;;  %s2326_s8 = smov %s2899_s11  }
 0x186   : >> { %s1448_s7 = scalar_lea.vmem %s1429_s4, %s1914_s10 [#allocation2]   ;;  %s1449_s6 = scalar_lea.vmem %s1431_s5, %s1914_s10  }
 0x18b PF: > { %s13_s16 = sadd.s32 1, %s2299_s16   ;;  %s2888_s12 = smov %s2287_s13 }
 0x18c   : > { %p10_p3 = scmp.ge.s32.totalorder %s13_s16, 47   ;;  %s2889_s13 = smov %s2394_s22 }
 0x18d   : > { %s2890_s14 = smov %s2295_s15  ;;  %s2891_s15 = smov %s2893_s18 }
 0x18e   :  { %12 = sbr.rel (!%p10_p3) target bundleno = 3 (0x3), region = 146 }

</bundles_post_ra>
